<compile_context>
chip_gen: v7x
topology: tpu7x:2x2x1
jax: 0.10.0
libtpu: 0.0.40
codegen_flags: <defaults>
</compile_context>

<pallas_src>
import math

import jax
import jax.numpy as jnp
import numpy as np
from jax.experimental import pallas as pl
from jax.experimental.pallas import tpu as pltpu


# ---------------------------------------------------------------------------
# Kernels
# ---------------------------------------------------------------------------

def _ffn_kernel_resident(x_ref, w1_ref, b1_ref, w2_ref, b2_ref, o_ref):
    """Weights fully VMEM-resident: one row tile per grid step, no accumulator."""
    h = jnp.dot(x_ref[...], w1_ref[...], preferred_element_type=jnp.float32)
    h = jnp.maximum(h + b1_ref[...], 0.0)                  # bias + relu (f32, VPU)
    # eval-mode dropout == identity, nothing to do here.
    y = jnp.dot(h.astype(jnp.bfloat16), w2_ref[...],
                preferred_element_type=jnp.float32)
    o_ref[...] = (y + b2_ref[...]).astype(o_ref.dtype)


def _ffn_kernel_tiled(x_ref, w1_ref, b1_ref, w2_ref, b2_ref, o_ref, acc_ref):
    """pf_dim tiled: accumulate partial fc2 products over the j grid axis."""
    j = pl.program_id(1)

    @pl.when(j == 0)
    def _():
        acc_ref[...] = jnp.zeros_like(acc_ref)

    h = jnp.dot(x_ref[...], w1_ref[...], preferred_element_type=jnp.float32)
    h = jnp.maximum(h + b1_ref[...], 0.0)
    acc_ref[...] += jnp.dot(h.astype(jnp.bfloat16), w2_ref[...],
                            preferred_element_type=jnp.float32)

    @pl.when(j == pl.num_programs(1) - 1)
    def _():
        o_ref[...] = (acc_ref[...] + b2_ref[...]).astype(o_ref.dtype)


# ---------------------------------------------------------------------------
# Hardware / tiling helpers
# ---------------------------------------------------------------------------

def _round_up(n, m):
    return ((n + m - 1) // m) * m


def _hw_info():
    """Best-effort per-generation targets (VMEM budget, core count, tiles)."""
    vmem_cap = None
    try:
        vmem_cap = int(pltpu.get_tpu_info().vmem_capacity_bytes)
    except Exception:
        vmem_cap = None
    kind = ""
    try:
        kind = jax.devices()[0].device_kind.lower()
    except Exception:
        pass
    is_v7 = "v7" in kind
    is_v5e = ("v5e" in kind) or ("v5 lite" in kind) or ("v5lite" in kind)
    if vmem_cap is None:
        vmem_cap = (64 << 20) if is_v7 else (128 << 20)
    # TensorCores the "parallel" row axis can shard across.
    num_cores = 2 if (is_v7 or "v4" in kind or "v5p" in kind) else 1
    # Scoped VMEM limit: well above the 16/32 MiB defaults, below physical.
    vmem_limit = int(min(100 << 20, vmem_cap * 7 // 8))
    if is_v5e:
        tm_tiled, tp_tiled = 512, 2048     # v5e is compute-bound already at 512
    elif is_v7:
        tm_tiled, tp_tiled = 1024, 1024    # 64 MiB VMEM: smaller pf tiles
    else:                                  # v6e and unknown
        tm_tiled, tp_tiled = 1024, 2048    # big tm to cross the weight-BW roofline
    return dict(vmem_cap=vmem_cap, vmem_limit=vmem_limit, num_cores=num_cores,
                tm_tiled=tm_tiled, tp_tiled=tp_tiled)


def _split_over_cores(tm, rows8, num_cores):
    """Cap tm so the 'parallel' row axis has >= num_cores tiles (v7x: 2 TCs)."""
    if num_cores <= 1 or rows8 <= 8:
        return tm
    per_core = _round_up(-(-rows8 // num_cores), 8)
    return max(8, min(tm, per_core))


def _resident_tm(rows, hid, pf, out_isz, hw):
    """Row tile for the weights-VMEM-resident path, or None if it can't fit."""
    rows8 = _round_up(max(rows, 1), 8)
    budget = hw["vmem_limit"] - (6 << 20)          # slack for compiler internals
    wbuf = 1 if hasattr(pl, "Buffered") else 2     # single-buffer weights if we can

    def need(tm):
        return (wbuf * 2 * hid * pf * 2            # W1 + W2 (bf16)
                + 2 * tm * hid * 2                 # x block (bf16, double-buffered)
                + 2 * tm * hid * out_isz           # out block (double-buffered)
                + tm * pf * 4                      # relu intermediate (f32)
                + tm * hid * 4)                    # fc2 f32 result before cast

    for cand in (512, 256, 128):
        tm = _split_over_cores(min(cand, rows8), rows8, hw["num_cores"])
        if need(tm) <= budget:
            return tm
    return None


def _tiled_tiles(rows, hid, pf, out_isz, hw):
    """(tm, tp) for the pf-tiled accumulator path, sized to the VMEM budget."""
    rows8 = _round_up(max(rows, 1), 8)
    budget = hw["vmem_limit"] - (6 << 20)
    tm = _split_over_cores(min(hw["tm_tiled"], rows8), rows8, hw["num_cores"])
    tp = min(hw["tp_tiled"], _round_up(pf, 128))

    def need(tm_, tp_):
        return (2 * 2 * hid * tp_ * 2              # W1 & W2 blocks, double-buffered bf16
                + 2 * tm_ * hid * 2                # x block
                + 2 * tm_ * hid * out_isz          # out block
                + tm_ * hid * 4                    # accumulator scratch
                + tm_ * tp_ * 4)                   # relu intermediate (f32)

    while need(tm, tp) > budget and tp > 128:
        tp = max(128, _round_up(tp // 2, 128))
    while need(tm, tp) > budget and tm > 16:
        tm = max(8, _round_up(tm // 2, 8))
    return tm, tp


# ---------------------------------------------------------------------------
# Wrapper
# ---------------------------------------------------------------------------

def feed_forward(x, params, *, force_tiled=False, tp_override=None):
    """x: (..., hid_dim).  Returns y with the same shape/dtype as x (eval mode)."""
    orig_shape = x.shape
    out_dtype = x.dtype
    hid = orig_shape[-1]
    rows = int(np.prod(orig_shape[:-1])) if len(orig_shape) > 1 else 1

    w1 = jnp.asarray(params["w1"])
    b1 = jnp.asarray(params["b1"])
    w2 = jnp.asarray(params["w2"])
    b2 = jnp.asarray(params["b2"])
    pf = w1.shape[1]

    hw = _hw_info()
    out_isz = jnp.dtype(out_dtype).itemsize

    # bf16 activations/weights once in the wrapper; biases stay f32.
    x2d = jnp.reshape(x, (rows, hid)).astype(jnp.bfloat16)
    w1b = w1.astype(jnp.bfloat16)
    w2b = w2.astype(jnp.bfloat16)
    b1r = jnp.reshape(b1, (1, pf)).astype(jnp.float32)
    b2r = jnp.reshape(b2, (1, hid)).astype(jnp.float32)

    def pad_rows(a, rows_p):
        return a if rows_p == rows else jnp.pad(a, ((0, rows_p - rows), (0, 0)))

    def run_resident(tm):
        rows_p = _round_up(rows, tm)
        xp = pad_rows(x2d, rows_p)
        # Weight block index is grid-invariant -> DMA'd once; single-buffer it
        # when supported (halves weight VMEM residency; matters for v7x 64 MiB).
        w_kw = {"pipeline_mode": pl.Buffered(1)} if hasattr(pl, "Buffered") else {}
        out = pl.pallas_call(
            _ffn_kernel_resident,
            out_shape=jax.ShapeDtypeStruct((rows_p, hid), out_dtype),
            grid_spec=pltpu.PrefetchScalarGridSpec(
                num_scalar_prefetch=0,
                grid=(rows_p // tm,),
                in_specs=[
                    pl.BlockSpec((tm, hid), lambda i: (i, 0)),           # x
                    pl.BlockSpec((hid, pf), lambda i: (0, 0), **w_kw),   # W1 (resident)
                    pl.BlockSpec((1, pf),   lambda i: (0, 0)),           # b1
                    pl.BlockSpec((pf, hid), lambda i: (0, 0), **w_kw),   # W2 (resident)
                    pl.BlockSpec((1, hid),  lambda i: (0, 0)),           # b2
                ],
                out_specs=pl.BlockSpec((tm, hid), lambda i: (i, 0)),
            ),
            compiler_params=pltpu.CompilerParams(
                dimension_semantics=("parallel",),
                vmem_limit_bytes=hw["vmem_limit"]),
        )(xp, w1b, b1r, w2b, b2r)
        return out[:rows]

    def run_tiled(tm, tp):
        rows_p = _round_up(rows, tm)
        pf_p = _round_up(pf, tp)
        xp = pad_rows(x2d, rows_p)
        w1p, b1p, w2p = w1b, b1r, w2b
        if pf_p != pf:   # padded h columns are relu(0)=0 and hit zero W2 rows -> exact
            w1p = jnp.pad(w1b, ((0, 0), (0, pf_p - pf)))
            w2p = jnp.pad(w2b, ((0, pf_p - pf), (0, 0)))
            b1p = jnp.pad(b1r, ((0, 0), (0, pf_p - pf)))
        out = pl.pallas_call(
            _ffn_kernel_tiled,
            out_shape=jax.ShapeDtypeStruct((rows_p, hid), out_dtype),
            grid_spec=pltpu.PrefetchScalarGridSpec(
                num_scalar_prefetch=0,
                grid=(rows_p // tm, pf_p // tp),
                in_specs=[
                    pl.BlockSpec((tm, hid), lambda i, j: (i, 0)),   # x
                    pl.BlockSpec((hid, tp), lambda i, j: (0, j)),   # W1
                    pl.BlockSpec((1, tp),   lambda i, j: (0, j)),   # b1
                    pl.BlockSpec((tp, hid), lambda i, j: (j, 0)),   # W2
                    pl.BlockSpec((1, hid),  lambda i, j: (0, 0)),   # b2
                ],
                out_specs=pl.BlockSpec((tm, hid), lambda i, j: (i, 0)),
                scratch_shapes=[pltpu.VMEM((tm, hid), jnp.float32)],
            ),
            compiler_params=pltpu.CompilerParams(
                dimension_semantics=("parallel", "arbitrary"),
                vmem_limit_bytes=hw["vmem_limit"]),
        )(xp, w1p, b1p, w2p, b2r)
        return out[:rows]

    if force_tiled:
        tm, tp = _tiled_tiles(rows, hid, pf, out_isz, hw)
        if tp_override is not None:
            tp = tp_override
        out2d = run_tiled(tm, tp)
    else:
        tm_res = _resident_tm(rows, hid, pf, out_isz, hw)
        if tm_res is not None:
            try:
                out2d = run_resident(tm_res)
            except Exception:
                # e.g. pl.Buffered(1) rejected / VMEM-tight on this build:
                # fall back to the conservatively-sized pf-tiled path.
                out2d = run_tiled(*_tiled_tiles(rows, hid, pf, out_isz, hw))
        else:
            out2d = run_tiled(*_tiled_tiles(rows, hid, pf, out_isz, hw))

    return out2d.reshape(orig_shape)


# ---------------------------------------------------------------------------
# Reference + self-test
# ---------------------------------------------------------------------------

def reference_ffn(x, params):
    """Pure-JAX reference mirroring the PyTorch module (eval mode), with the
    same bf16-operand / f32-accumulate precision contract as the kernel."""
    w1 = params["w1"].astype(jnp.bfloat16)
    w2 = params["w2"].astype(jnp.bfloat16)
    h = jnp.dot(x.astype(jnp.bfloat16), w1,
                preferred_element_type=jnp.float32) + params["b1"]
    h = jnp.maximum(h, 0.0)
    y = jnp.dot(h.astype(jnp.bfloat16), w2,
                preferred_element_type=jnp.float32) + params["b2"]
    return y.astype(x.dtype)


if __name__ == "__main__":
    key0 = jax.random.PRNGKey(0)
    keys = jax.random.split(key0, 10)

    def init_linear(kw, kb, fan_in, fan_out):
        bound = 1.0 / math.sqrt(fan_in)
        w = jax.random.uniform(kw, (fan_in, fan_out), jnp.float32, -bound, bound)
        b = jax.random.uniform(kb, (fan_out,), jnp.float32, -bound, bound)
        return w, b

    # Case 1: small shapes consistent with the module (batch=2, seq=8,
    # hid_dim=32, pf_dim=64) -> weights-resident fast path.
    B, L, HID, PF = 2, 8, 32, 64
    w1, b1 = init_linear(keys[0], keys[1], HID, PF)
    w2, b2 = init_linear(keys[2], keys[3], PF, HID)
    params = dict(w1=w1, b1=b1, w2=w2, b2=b2)
    x = jax.random.normal(keys[4], (B, L, HID), jnp.float32)

    y = feed_forward(x, params)
    jax.block_until_ready(y)
    np.testing.assert_allclose(np.asarray(y), np.asarray(reference_ffn(x, params)),
                               rtol=2e-2, atol=2e-2)

    # Case 2: force the pf-tiled accumulator path (pf=256 split into tp=128
    # chunks) to also validate the init/accumulate/finalize pattern.
    PF2 = 256
    w1c, b1c = init_linear(keys[5], keys[6], HID, PF2)
    w2c, b2c = init_linear(keys[7], keys[8], PF2, HID)
    params2 = dict(w1=w1c, b1=b1c, w2=w2c, b2=b2c)
    x2 = jax.random.normal(keys[9], (B, L, HID), jnp.float32)

    y2 = feed_forward(x2, params2, force_tiled=True, tp_override=128)
    jax.block_until_ready(y2)
    np.testing.assert_allclose(np.asarray(y2), np.asarray(reference_ffn(x2, params2)),
                               rtol=2e-2, atol=2e-2)

    print("KERNEL_OK")
</pallas_src>

<mosaic_0001>
module attributes {stable_mosaic.version = 11 : i64} {
  func.func @_ffn_kernel_resident(%arg0: i32, %arg1: memref<16x32xbf16, #tpu.memory_space<vmem>>, %arg2: memref<32x64xbf16, #tpu.memory_space<vmem>>, %arg3: memref<1x64xf32, #tpu.memory_space<vmem>>, %arg4: memref<64x32xbf16, #tpu.memory_space<vmem>>, %arg5: memref<1x32xf32, #tpu.memory_space<vmem>>, %arg6: memref<16x32xf32, #tpu.memory_space<vmem>>) attributes {dimension_semantics = [#tpu.dimension_semantics<parallel>], iteration_bounds = array<i64: 1>, scalar_prefetch = 0 : i64, scratch_operands = 0 : i64, tpu.core_type = #tpu.core_type<tc>, window_params = [{transform_indices = @transform_0, window_bounds = array<i64: 16, 32>}, {pipeline_mode = #tpu.pipeline_mode<synchronous>, transform_indices = @transform_1, window_bounds = array<i64: 32, 64>}, {pipeline_mode = #tpu.pipeline_mode<synchronous>, transform_indices = @transform_2, window_bounds = array<i64: 1, 64>}, {pipeline_mode = #tpu.pipeline_mode<synchronous>, transform_indices = @transform_3, window_bounds = array<i64: 64, 32>}, {pipeline_mode = #tpu.pipeline_mode<synchronous>, transform_indices = @transform_4, window_bounds = array<i64: 1, 32>}, {transform_indices = @transform_5, window_bounds = array<i64: 16, 32>}]} {
    %c0 = arith.constant 0 : index
    %c0_0 = arith.constant 0 : index
    %0 = vector.load %arg1[%c0, %c0_0] : memref<16x32xbf16, #tpu.memory_space<vmem>>, vector<16x32xbf16>
    %c0_1 = arith.constant 0 : index
    %c0_2 = arith.constant 0 : index
    %1 = vector.load %arg2[%c0_1, %c0_2] : memref<32x64xbf16, #tpu.memory_space<vmem>>, vector<32x64xbf16>
    %cst = arith.constant dense<0.000000e+00> : vector<16x64xf32>
    %2 = tpu.matmul %0, %1, %cst {dimension_numbers = #tpu.dot_dimension_numbers<[1], [0], [0], [1], [0, 0, 1, 1], [], []>} : vector<16x32xbf16>, vector<32x64xbf16>, vector<16x64xf32> -> vector<16x64xf32>
    %c0_3 = arith.constant 0 : index
    %c0_4 = arith.constant 0 : index
    %3 = vector.load %arg3[%c0_3, %c0_4] : memref<1x64xf32, #tpu.memory_space<vmem>>, vector<1x64xf32>
    %4 = vector.broadcast %3 : vector<1x64xf32> to vector<16x64xf32>
    %5 = arith.addf %2, %4 : vector<16x64xf32>
    %cst_5 = arith.constant 0.000000e+00 : f32
    %6 = vector.broadcast %cst_5 : f32 to vector<16x64xf32>
    %7 = arith.maximumf %5, %6 : vector<16x64xf32>
    %8 = arith.truncf %7 : vector<16x64xf32> to vector<16x64xbf16>
    %c0_6 = arith.constant 0 : index
    %c0_7 = arith.constant 0 : index
    %9 = vector.load %arg4[%c0_6, %c0_7] : memref<64x32xbf16, #tpu.memory_space<vmem>>, vector<64x32xbf16>
    %cst_8 = arith.constant dense<0.000000e+00> : vector<16x32xf32>
    %10 = tpu.matmul %8, %9, %cst_8 {dimension_numbers = #tpu.dot_dimension_numbers<[1], [0], [0], [1], [0, 0, 1, 1], [], []>} : vector<16x64xbf16>, vector<64x32xbf16>, vector<16x32xf32> -> vector<16x32xf32>
    %c0_9 = arith.constant 0 : index
    %c0_10 = arith.constant 0 : index
    %11 = vector.load %arg5[%c0_9, %c0_10] : memref<1x32xf32, #tpu.memory_space<vmem>>, vector<1x32xf32>
    %12 = vector.broadcast %11 : vector<1x32xf32> to vector<16x32xf32>
    %13 = arith.addf %10, %12 : vector<16x32xf32>
    %c0_11 = arith.constant 0 : index
    %c0_12 = arith.constant 0 : index
    %14 = vector.load %arg6[%c0_11, %c0_12] : memref<16x32xf32, #tpu.memory_space<vmem>>, vector<16x32xf32>
    tpu.vector_store %arg6[%c0_11, %c0_12], %13 {strides = array<i32>} : memref<16x32xf32, #tpu.memory_space<vmem>>, vector<16x32xf32>,
    return
  }
  func.func @transform_0(%arg0: i32) -> (i32, i32) {
    %c0_i32 = arith.constant 0 : i32
    %c0_i32_0 = arith.constant 0 : i32
    return %arg0, %c0_i32 : i32, i32
  }
  func.func @transform_1(%arg0: i32) -> (i32, i32) {
    %c0_i32 = arith.constant 0 : i32
    %c0_i32_0 = arith.constant 0 : i32
    %c0_i32_1 = arith.constant 0 : i32
    return %c0_i32, %c0_i32_0 : i32, i32
  }
  func.func @transform_2(%arg0: i32) -> (i32, i32) {
    %c0_i32 = arith.constant 0 : i32
    %c0_i32_0 = arith.constant 0 : i32
    %c0_i32_1 = arith.constant 0 : i32
    return %c0_i32, %c0_i32_0 : i32, i32
  }
  func.func @transform_3(%arg0: i32) -> (i32, i32) {
    %c0_i32 = arith.constant 0 : i32
    %c0_i32_0 = arith.constant 0 : i32
    %c0_i32_1 = arith.constant 0 : i32
    return %c0_i32, %c0_i32_0 : i32, i32
  }
  func.func @transform_4(%arg0: i32) -> (i32, i32) {
    %c0_i32 = arith.constant 0 : i32
    %c0_i32_0 = arith.constant 0 : i32
    %c0_i32_1 = arith.constant 0 : i32
    return %c0_i32, %c0_i32_0 : i32, i32
  }
  func.func @transform_5(%arg0: i32) -> (i32, i32) {
    %c0_i32 = arith.constant 0 : i32
    %c0_i32_0 = arith.constant 0 : i32
    return %arg0, %c0_i32 : i32, i32
  }
}

module attributes {stable_mosaic.version = 11 : i64} {
  func.func @_ffn_kernel_tiled(%arg0: i32, %arg1: i32, %arg2: memref<16x32xbf16, #tpu.memory_space<vmem>>, %arg3: memref<32x128xbf16, #tpu.memory_space<vmem>>, %arg4: memref<1x128xf32, #tpu.memory_space<vmem>>, %arg5: memref<128x32xbf16, #tpu.memory_space<vmem>>, %arg6: memref<1x32xf32, #tpu.memory_space<vmem>>, %arg7: memref<16x32xf32, #tpu.memory_space<vmem>>, %arg8: memref<16x32xf32, #tpu.memory_space<vmem>>) attributes {dimension_semantics = [#tpu.dimension_semantics<parallel>, #tpu.dimension_semantics<arbitrary>], iteration_bounds = array<i64: 1, 1>, scalar_prefetch = 0 : i64, scratch_operands = 1 : i64, tpu.core_type = #tpu.core_type<tc>, window_params = [{transform_indices = @transform_0, window_bounds = array<i64: 16, 32>}, {transform_indices = @transform_1, window_bounds = array<i64: 32, 128>}, {transform_indices = @transform_2, window_bounds = array<i64: 1, 128>}, {transform_indices = @transform_3, window_bounds = array<i64: 128, 32>}, {pipeline_mode = #tpu.pipeline_mode<synchronous>, transform_indices = @transform_4, window_bounds = array<i64: 1, 32>}, {transform_indices = @transform_5, window_bounds = array<i64: 16, 32>}]} {
    %c0_i32 = arith.constant 0 : i32
    %0 = arith.cmpi eq, %arg1, %c0_i32 : i32
    %1 = arith.extui %0 : i1 to i32
    %c0_i32_0 = arith.constant 0 : i32
    %2 = arith.cmpi ne, %1, %c0_i32_0 : i32
    scf.if %2 {
      %cst_16 = arith.constant 0.000000e+00 : f32
      %20 = vector.broadcast %cst_16 : f32 to vector<16x32xf32>
      %c0_17 = arith.constant 0 : index
      %c0_18 = arith.constant 0 : index
      %21 = vector.load %arg8[%c0_17, %c0_18] : memref<16x32xf32, #tpu.memory_space<vmem>>, vector<16x32xf32>
      tpu.vector_store %arg8[%c0_17, %c0_18], %20 {strides = array<i32>} : memref<16x32xf32, #tpu.memory_space<vmem>>, vector<16x32xf32>,
    } else {
    }
    %c0 = arith.constant 0 : index
    %c0_1 = arith.constant 0 : index
    %3 = vector.load %arg2[%c0, %c0_1] : memref<16x32xbf16, #tpu.memory_space<vmem>>, vector<16x32xbf16>
    %c0_2 = arith.constant 0 : index
    %c0_3 = arith.constant 0 : index
    %4 = vector.load %arg3[%c0_2, %c0_3] : memref<32x128xbf16, #tpu.memory_space<vmem>>, vector<32x128xbf16>
    %cst = arith.constant dense<0.000000e+00> : vector<16x128xf32>
    %5 = tpu.matmul %3, %4, %cst {dimension_numbers = #tpu.dot_dimension_numbers<[1], [0], [0], [1], [0, 0, 1, 1], [], []>} : vector<16x32xbf16>, vector<32x128xbf16>, vector<16x128xf32> -> vector<16x128xf32>
    %c0_4 = arith.constant 0 : index
    %c0_5 = arith.constant 0 : index
    %6 = vector.load %arg4[%c0_4, %c0_5] : memref<1x128xf32, #tpu.memory_space<vmem>>, vector<1x128xf32>
    %7 = vector.broadcast %6 : vector<1x128xf32> to vector<16x128xf32>
    %8 = arith.addf %5, %7 : vector<16x128xf32>
    %cst_6 = arith.constant 0.000000e+00 : f32
    %9 = vector.broadcast %cst_6 : f32 to vector<16x128xf32>
    %10 = arith.maximumf %8, %9 : vector<16x128xf32>
    %c0_7 = arith.constant 0 : index
    %c0_8 = arith.constant 0 : index
    %11 = vector.load %arg8[%c0_7, %c0_8] : memref<16x32xf32, #tpu.memory_space<vmem>>, vector<16x32xf32>
    %12 = arith.truncf %10 : vector<16x128xf32> to vector<16x128xbf16>
    %c0_9 = arith.constant 0 : index
    %c0_10 = arith.constant 0 : index
    %13 = vector.load %arg5[%c0_9, %c0_10] : memref<128x32xbf16, #tpu.memory_space<vmem>>, vector<128x32xbf16>
    %cst_11 = arith.constant dense<0.000000e+00> : vector<16x32xf32>
    %14 = tpu.matmul %12, %13, %cst_11 {dimension_numbers = #tpu.dot_dimension_numbers<[1], [0], [0], [1], [0, 0, 1, 1], [], []>} : vector<16x128xbf16>, vector<128x32xbf16>, vector<16x32xf32> -> vector<16x32xf32>
    %15 = arith.addf %11, %14 : vector<16x32xf32>
    %c0_12 = arith.constant 0 : index
    %c0_13 = arith.constant 0 : index
    %16 = vector.load %arg8[%c0_12, %c0_13] : memref<16x32xf32, #tpu.memory_space<vmem>>, vector<16x32xf32>
    tpu.vector_store %arg8[%c0_12, %c0_13], %15 {strides = array<i32>} : memref<16x32xf32, #tpu.memory_space<vmem>>, vector<16x32xf32>,
    %c0_i32_14 = arith.constant 0 : i32
    %17 = arith.cmpi eq, %arg1, %c0_i32_14 : i32
    %18 = arith.extui %17 : i1 to i32
    %c0_i32_15 = arith.constant 0 : i32
    %19 = arith.cmpi ne, %18, %c0_i32_15 : i32
    scf.if %19 {
      %c0_16 = arith.constant 0 : index
      %c0_17 = arith.constant 0 : index
      %20 = vector.load %arg8[%c0_16, %c0_17] : memref<16x32xf32, #tpu.memory_space<vmem>>, vector<16x32xf32>
      %c0_18 = arith.constant 0 : index
      %c0_19 = arith.constant 0 : index
      %21 = vector.load %arg6[%c0_18, %c0_19] : memref<1x32xf32, #tpu.memory_space<vmem>>, vector<1x32xf32>
      %22 = vector.broadcast %21 : vector<1x32xf32> to vector<16x32xf32>
      %23 = arith.addf %20, %22 : vector<16x32xf32>
      %c0_20 = arith.constant 0 : index
      %c0_21 = arith.constant 0 : index
      %24 = vector.load %arg7[%c0_20, %c0_21] : memref<16x32xf32, #tpu.memory_space<vmem>>, vector<16x32xf32>
      tpu.vector_store %arg7[%c0_20, %c0_21], %23 {strides = array<i32>} : memref<16x32xf32, #tpu.memory_space<vmem>>, vector<16x32xf32>,
    } else {
    }
    return
  }
  func.func @transform_0(%arg0: i32, %arg1: i32) -> (i32, i32) {
    %c0_i32 = arith.constant 0 : i32
    %c0_i32_0 = arith.constant 0 : i32
    return %arg0, %c0_i32 : i32, i32
  }
  func.func @transform_1(%arg0: i32, %arg1: i32) -> (i32, i32) {
    %c0_i32 = arith.constant 0 : i32
    %c0_i32_0 = arith.constant 0 : i32
    return %c0_i32, %arg1 : i32, i32
  }
  func.func @transform_2(%arg0: i32, %arg1: i32) -> (i32, i32) {
    %c0_i32 = arith.constant 0 : i32
    %c0_i32_0 = arith.constant 0 : i32
    return %c0_i32, %arg1 : i32, i32
  }
  func.func @transform_3(%arg0: i32, %arg1: i32) -> (i32, i32) {
    %c0_i32 = arith.constant 0 : i32
    %c0_i32_0 = arith.constant 0 : i32
    return %arg1, %c0_i32 : i32, i32
  }
  func.func @transform_4(%arg0: i32, %arg1: i32) -> (i32, i32) {
    %c0_i32 = arith.constant 0 : i32
    %c0_i32_0 = arith.constant 0 : i32
    %c0_i32_1 = arith.constant 0 : i32
    return %c0_i32, %c0_i32_0 : i32, i32
  }
  func.func @transform_5(%arg0: i32, %arg1: i32) -> (i32, i32) {
    %c0_i32 = arith.constant 0 : i32
    %c0_i32_0 = arith.constant 0 : i32
    return %arg0, %c0_i32 : i32, i32
  }
}

</mosaic_0001>

<bundles_post_ra>
// kernel: tpu_custom_call.1
= control target key start
LH: loop header
LB: loop body
LE: loop exit
PB: predicated region body
PF: predicated region fallthrough
CT: control target
= control target key end

     0   :  { %10 = vsyncpa [#allocation3], 0  ;;  %s600_s0 = inlined_call_operand.hbm [shape: bf16[16,32], index: 0, kind: input, shape index: {}]   ;;  %s601_s1 = inlined_call_operand.hbm [shape: bf16[32,64], index: 1, kind: input, shape index: {}]   ;;  %s602_s2 = inlined_call_operand.hbm [shape: f32[1,64], index: 2, kind: input, shape index: {}]   ;;  %s603_s3 = inlined_call_operand.hbm [shape: bf16[64,32], index: 3, kind: input, shape index: {}]   ;;  %s604_s4 = inlined_call_operand.hbm [shape: f32[1,32], index: 4, kind: input, shape index: {}]   ;;  %s605_s5 = inlined_call_operand.hbm [shape: f32[16,32], index: 5, kind: output, shape index: {}]  }
   0x1   :  { %11 = vsyncpa [#allocation6], 0 }
   0x2   :  { %12 = vsyncpa [#allocation9], 0 }
   0x3   :  { %13 = vsyncpa [#allocation4], 0  ;;  %s467_s18 = smov [#allocation5]   ;;  %s468_s20 = smov [#allocation8]  }
   0x4   :  { %s31_s19 = sshll.u32 %s467_s18, 4  ;;  %s53_s21 = sshll.u32 %s468_s20, 4  ;;  %s32_s19 = int_to_ptr.vmem [resolvable:$true] %s31_s19  ;;  %s509_s21 = int_to_ptr.vmem [resolvable:$true] %s53_s21 }
   0x5   :  { %s327_s24 = scalar_lea.hbm %s601_s1, 256 }
   0x6   :  { %p328_p0 = scmp.ne.s32.totalorder %s601_s1, %s327_s24  ;;  %p331_p1 = scmp.lt.u32.totalorder %s327_s24, %s601_s1 }
   0x8   :  { %p333_p2 = pnand %p331_p1, %p328_p0 }
   0xa   :  { %336 = shalt.err (!%p333_p2)
}
   0xb   :  { %s337_s29 = scalar_lea.vmem %s32_s19, 256  ;;  %p342_p4 = scmp.lt.s32.totalorder %s32_s19, %s32_s19 }
   0xc   :  { %p338_p3 = scmp.ne.s32.totalorder %s32_s19, %s337_s29  ;;  %p343_p5 = scmp.lt.s32.totalorder %s337_s29, %s337_s29 }
   0xe   :  { %p344_p6 = por %p343_p5, %p342_p4 }
  0x10   :  { %p345_p7 = pnand %p344_p6, %p338_p3 }
  0x12   :  { %348 = shalt.err (!%p345_p7)
}
  0x13   :  { %s469_s30 = smov 64   ;;  %s470_s6 = smov 4  }
  0x14   :  { %37 = dma.hbm_to_vmem [thread:$0]  %s601_s1, 256, %s32_s19, [#allocation6], %s469_s30, %s469_s30, %s470_s6  }
  0x15   :  { %s349_s11 = scalar_lea.hbm %s603_s3, 512 }
  0x16   :  { %p350_p8 = scmp.ne.s32.totalorder %s603_s3, %s349_s11  ;;  %p353_p9 = scmp.lt.u32.totalorder %s349_s11, %s603_s3 }
  0x18   :  { %p355_p10 = pnand %p353_p9, %p350_p8 }
  0x1a   :  { %358 = shalt.err (!%p355_p10)
}
  0x1b   :  { %s359_s16 = scalar_lea.vmem %s509_s21, 512  ;;  %p364_p12 = scmp.lt.s32.totalorder %s509_s21, %s509_s21 }
  0x1c   :  { %p360_p11 = scmp.ne.s32.totalorder %s509_s21, %s359_s16  ;;  %p365_p13 = scmp.lt.s32.totalorder %s359_s16, %s359_s16 }
  0x1e   :  { %p366_p0 = por %p365_p13, %p364_p12 }
  0x20   :  { %p367_p1 = pnand %p366_p0, %p360_p11 }
  0x22   :  { %370 = shalt.err (!%p367_p1)
}
  0x23   :  { %59 = dma.hbm_to_vmem [thread:$0]  %s603_s3, 512, %s509_s21, [#allocation9], %s469_s30, %s469_s30, %s470_s6  }
  0x24   :  { %s471_s18 = smov [#allocation2]   ;;  %s472_s20 = smov [#allocation7]  }
  0x25   :  { %s19_s19 = sshll.u32 %s471_s18, 4  ;;  %s44_s22 = sshll.u32 %s472_s20, 4  ;;  %s20_s19 = int_to_ptr.vmem [resolvable:$true] %s19_s19  ;;  %s45_s22 = int_to_ptr.vmem [resolvable:$true] %s44_s22 }
  0x26   :  { %s371_s25 = scalar_lea.hbm %s600_s0, 128 }
  0x27   :  { %p372_p2 = scmp.ne.s32.totalorder %s600_s0, %s371_s25  ;;  %p375_p3 = scmp.lt.u32.totalorder %s371_s25, %s600_s0 }
  0x29   :  { %p377_p4 = pnand %p375_p3, %p372_p2 }
  0x2b   :  { %380 = shalt.err (!%p377_p4)
}
  0x2c   :  { %s381_s3 = scalar_lea.vmem %s20_s19, 128  ;;  %p386_p6 = scmp.lt.s32.totalorder %s20_s19, %s20_s19 }
  0x2d   :  { %p382_p5 = scmp.ne.s32.totalorder %s20_s19, %s381_s3  ;;  %p387_p7 = scmp.lt.s32.totalorder %s381_s3, %s381_s3 }
  0x2f   :  { %p388_p8 = por %p387_p7, %p386_p6 }
  0x31   :  { %p389_p9 = pnand %p388_p8, %p382_p5 }
  0x33   :  { %392 = shalt.err (!%p389_p9)
}
  0x34   :  { %25 = dma.hbm_to_vmem [thread:$0]  %s600_s0, 128, %s20_s19, [#allocation3], %s469_s30, %s469_s30, %s470_s6  }
  0x35   :  { %s393_s10 = scalar_lea.hbm %s602_s2, 16 }
  0x36   :  { %p394_p10 = scmp.ne.s32.totalorder %s602_s2, %s393_s10  ;;  %p397_p11 = scmp.lt.u32.totalorder %s393_s10, %s602_s2 }
  0x38   :  { %p399_p12 = pnand %p397_p11, %p394_p10 }
  0x3a   :  { %402 = shalt.err (!%p399_p12)
}
  0x3b   :  { %s403_s15 = scalar_lea.vmem %s45_s22, 16  ;;  %s407_s16 = scalar_lea.vmem %s45_s22, 32 }
  0x3c   :  { %p404_p13 = scmp.ne.s32.totalorder %s45_s22, %s403_s15  ;;  %p408_p0 = scmp.lt.s32.totalorder %s45_s22, %s45_s22 }
  0x3d   :  { %p409_p1 = scmp.lt.s32.totalorder %s407_s16, %s403_s15 }
  0x3f   :  { %p410_p2 = por %p409_p1, %p408_p0 }
  0x41   :  { %p411_p3 = pnand %p410_p2, %p404_p13 }
  0x43   :  { %414 = shalt.err (!%p411_p3)
}
  0x44   :  { %47 = dma.hbm_to_vmem [thread:$0]  %s602_s2, 16, %s45_s22, [#allocation6]  }
  0x45   :  { %s473_s6 = smov [#allocation10]   ;;  %s415_s19 = scalar_lea.hbm %s604_s4, 16 }
  0x46   :  { %s66_s1 = sshll.u32 %s473_s6, 4  ;;  %p416_p4 = scmp.ne.s32.totalorder %s604_s4, %s415_s19  ;;  %s67_s1 = int_to_ptr.vmem [resolvable:$true] %s66_s1 }
  0x47   :  { %p419_p5 = scmp.lt.u32.totalorder %s415_s19, %s604_s4 }
  0x49   :  { %p421_p6 = pnand %p419_p5, %p416_p4 }
  0x4b   :  { %424 = shalt.err (!%p421_p6)
}
  0x4c   :  { %s425_s26 = scalar_lea.vmem %s67_s1, 16  ;;  %s429_s2 = scalar_lea.vmem %s67_s1, 32 }
  0x4d   :  { %p426_p7 = scmp.ne.s32.totalorder %s67_s1, %s425_s26  ;;  %p430_p8 = scmp.lt.s32.totalorder %s67_s1, %s67_s1 }
  0x4e   :  { %p431_p9 = scmp.lt.s32.totalorder %s429_s2, %s425_s26 }
  0x50   :  { %p432_p10 = por %p431_p9, %p430_p8 }
  0x52   :  { %p433_p11 = pnand %p432_p10, %p426_p7 }
  0x54   :  { %436 = shalt.err (!%p433_p11)
}
  0x55   :  { %69 = dma.hbm_to_vmem [thread:$0]  %s604_s4, 16, %s67_s1, [#allocation9]  }
  0x56   :  { %459 = dma.done.wait [#allocation3], 128  }
  0x57   :  { %460 = vsyncadd [#allocation3], 4294967168 }
  0x58   :  { %461 = dma.done.wait [#allocation6], 272  }
  0x59   :  { %462 = vsyncadd [#allocation6], 4294967024 }
  0x5a   :  { %463 = dma.done.wait [#allocation9], 528  }
  0x5b   :  { %464 = vsyncadd [#allocation9], 4294966768  ;;  %v474_v0 = vmov 0.0   ;;  %vm475_vm0 = vmmov 0   ;;  %v320_v1 = vld [vmem:[#allocation5] sm:$0xff]   ;;  %v321_v2 = vld [vmem:[#allocation5 + $0x8] sm:$0xff]  }
  0x5c   :  { %288 = vmatprep.subr.bf16.mxu0 %v474_v0  ;;  %292 = vmatprep.mubr.msk.bf16.mxu0 %vm475_vm0, %v474_v0  ;;  %v323_v3 = vld [vmem:[#allocation8] sm:$0xff]   ;;  %v324_v5 = vld [vmem:[#allocation8 + $0x8] sm:$0xff]   ;;  %vm116_vm1 = vcmask 261120   ;;  %v325_v6 = vld [vmem:[#allocation8 + $0x10] sm:$0xff]   ;;  %vm203_vm2 = vcmask 523264   ;;  %s476_s4 = smov [#allocation11]  }
  0x5d   :  { %296 = vmatprep.subr.bf16.mxu1 %v474_v0  ;;  %304 = vmatprep.mubr.msk.bf16.mxu1 %vm475_vm0, %v474_v0  ;;  %v322_v4 = vld [vmem:[#allocation2] sm:$0xff]   ;;  %v326_v7 = vld [vmem:[#allocation8 + $0x18] sm:$0xff]   ;;  %v274_v18 = vld [vmem:[#allocation10] ss:$0 sm:$0xff]  ;;  %s255_s28 = sshll.u32 %s476_s4, 4  ;;  %s256_s28 = int_to_ptr.vmem [resolvable:$true] %s255_s28 }
  0x5e   :  { %289 = vmatpush3.bf16.msra.mxu0 %v320_v1  ;;  %297 = vmatpush3.bf16.msra.mxu1 %v323_v3  ;;  %v269_v8 = vld [vmem:[#allocation7] ss:$0 sm:$0xff]  ;;  %s437_s29 = scalar_lea.vmem %s256_s28, 256  ;;  %p442_p13 = scmp.lt.s32.totalorder %s256_s28, %s256_s28 }
  0x5f   :  { %290 = vmatprep.subr.bf16.mxu0 %v474_v0  ;;  %298 = vmatprep.subr.bf16.mxu1 %v474_v0  ;;  %p438_p12 = scmp.ne.s32.totalorder %s256_s28, %s437_s29  ;;  %p443_p0 = scmp.lt.s32.totalorder %s437_s29, %s437_s29 }
  0x61   :  { %p444_p1 = por %p443_p0, %p442_p13 }
  0x62   :  { %291 = vmatpush3.bf16.msra.mxu0 %v321_v2  ;;  %299 = vmatpush3.bf16.msra.mxu1 %v324_v5 }
  0x63   :  { %300 = vmatprep.subr.bf16.mxu1 %v474_v0  ;;  %p445_p2 = pnand %p444_p1, %p438_p12 }
  0x65   :  { %293 = vmatmul.mubr.msk.bf16.vlgmr.msra.gmra.mrb[0].mxu0 %vm116_vm1, %v322_v4 }
  0x66   :  { %301 = vmatpush3.bf16.msra.mxu1 %v325_v6 }
  0x67   :  { %302 = vmatprep.subr.bf16.mxu1 %v474_v0 }
  0x6a   :  { %303 = vmatpush3.bf16.msra.mxu1 %v326_v7 }
 0x138   :  { %v154_v9 = vpop.f32.mrb[0].mxu0 }
 0x139   :  { %v155_v10 = vadd.f32 %v269_v8, %v154_v9  ;;  %v294_v11 = vpop.f32.mrb[1].mxu0 }
 0x13a   :  { %v157_v12 = vpop.f32.mrb[2].mxu0 }
 0x13b   :  { %v158_v13 = vadd.f32 %v269_v8, %v157_v12  ;;  %v295_v14 = vpop.f32.mrb[3].mxu0  ;;  %v161_v15 = vmax.f32 %v155_v10, 0.0 }
 0x13d   :  { %v162_v16 = vmax.f32 %v158_v13, 0.0 }
 0x13f   :  { %v163_v17 = vpack.c.bf16 %v162_v16, %v161_v15 }
 0x141   :  { %305 = vmatmul.mubr.msk.bf16.vlgmr.msra.gmra.mrb[0].mxu1 %vm203_vm2, %v163_v17 }
 0x214   :  { %v241_v19 = vpop.f32.mrb[0].mxu1 }
 0x215   :  { %v242_v20 = vadd.f32 %v274_v18, %v241_v19  ;;  %v306_v21 = vpop.f32.mrb[1].mxu1 }
 0x216   :  { %v244_v22 = vpop.f32.mrb[2].mxu1 }
 0x217   :  { %248 = vst.msk [vmem:[#allocation11] sm:$0xff] %vm116_vm1, %v242_v20  ;;  %v245_v23 = vadd.f32 %v274_v18, %v244_v22  ;;  %v307_v24 = vpop.f32.mrb[3].mxu1 }
 0x219   :  { %249 = vst.msk [vmem:[#allocation11 + $0x8] sm:$0xff] %vm116_vm1, %v245_v23 }
 0x21a   :  { %448 = shalt.err (!%p445_p2)
}
 0x21b   :  { %s449_s7 = scalar_lea.hbm %s605_s5, 256 }
 0x21c   :  { %p450_p3 = scmp.ne.s32.totalorder %s605_s5, %s449_s7  ;;  %p453_p4 = scmp.lt.u32.totalorder %s449_s7, %s605_s5 }
 0x21e   :  { %p455_p5 = pnand %p453_p4, %p450_p3 }
 0x220   :  { %458 = shalt.err (!%p455_p5)
}
 0x221   :  { %s477_s12 = smov 128   ;;  %s478_s13 = smov 8  }
 0x222   :  { %261 = dma.vmem_to_hbm [thread:$0]  %s256_s28, 256, %s605_s5, [#allocation4], %s477_s12, %s477_s12, %s478_s13  }
 0x223   :  { %465 = dma.done.wait [#allocation4], 256  }
 0x224   :  { %466 = vsyncadd [#allocation4], 4294967040 }
 0x225   :  { %265 = vsyncpa [#allocation3], 1 }
 0x226   :  { %266 = vsyncpa [#allocation6], 1 }
 0x227   :  { %267 = vsyncpa [#allocation9], 1 }
 0x228   :  { %268 = vsyncpa [#allocation4], 1 }

// kernel: tpu_custom_call.1
= control target key start
LH: loop header
LB: loop body
LE: loop exit
PB: predicated region body
PF: predicated region fallthrough
CT: control target
= control target key end

     0   :  { %10 = vsyncpa [#allocation4], 0  ;;  %s671_s0 = inlined_call_operand.hbm [shape: bf16[16,32], index: 0, kind: input, shape index: {}]   ;;  %s672_s1 = inlined_call_operand.hbm [shape: bf16[32,128], index: 1, kind: input, shape index: {}]   ;;  %s673_s2 = inlined_call_operand.hbm [shape: f32[1,128], index: 2, kind: input, shape index: {}]   ;;  %s674_s3 = inlined_call_operand.hbm [shape: bf16[128,32], index: 3, kind: input, shape index: {}]   ;;  %s675_s4 = inlined_call_operand.hbm [shape: f32[1,32], index: 4, kind: input, shape index: {}]   ;;  %s676_s5 = inlined_call_operand.hbm [shape: f32[16,32], index: 5, kind: output, shape index: {}]  }
   0x1   :  { %11 = vsyncpa [#allocation7], 0 }
   0x2   :  { %12 = vsyncpa [#allocation10], 0 }
   0x3   :  { %13 = vsyncpa [#allocation5], 0  ;;  %s534_s18 = smov [#allocation6]   ;;  %s535_s20 = smov [#allocation9]  }
   0x4   :  { %s31_s19 = sshll.u32 %s534_s18, 4  ;;  %s53_s21 = sshll.u32 %s535_s20, 4  ;;  %s32_s19 = int_to_ptr.vmem [resolvable:$true] %s31_s19  ;;  %s576_s21 = int_to_ptr.vmem [resolvable:$true] %s53_s21 }
   0x5   :  { %s394_s24 = scalar_lea.hbm %s672_s1, 256 }
   0x6   :  { %p395_p0 = scmp.ne.s32.totalorder %s672_s1, %s394_s24  ;;  %p398_p1 = scmp.lt.u32.totalorder %s394_s24, %s672_s1 }
   0x8   :  { %p400_p2 = pnand %p398_p1, %p395_p0 }
   0xa   :  { %403 = shalt.err (!%p400_p2)
}
   0xb   :  { %s404_s29 = scalar_lea.vmem %s32_s19, 256  ;;  %p409_p4 = scmp.lt.s32.totalorder %s32_s19, %s32_s19 }
   0xc   :  { %p405_p3 = scmp.ne.s32.totalorder %s32_s19, %s404_s29  ;;  %p410_p5 = scmp.lt.s32.totalorder %s404_s29, %s404_s29 }
   0xe   :  { %p411_p6 = por %p410_p5, %p409_p4 }
  0x10   :  { %p412_p7 = pnand %p411_p6, %p405_p3 }
  0x12   :  { %415 = shalt.err (!%p412_p7)
}
  0x13   :  { %s536_s30 = smov 64   ;;  %s537_s6 = smov 4  }
  0x14   :  { %37 = dma.hbm_to_vmem [thread:$0]  %s672_s1, 256, %s32_s19, [#allocation7], %s536_s30, %s536_s30, %s537_s6  }
  0x15   :  { %s416_s11 = scalar_lea.hbm %s674_s3, 1024 }
  0x16   :  { %p417_p8 = scmp.ne.s32.totalorder %s674_s3, %s416_s11  ;;  %p420_p9 = scmp.lt.u32.totalorder %s416_s11, %s674_s3 }
  0x18   :  { %p422_p10 = pnand %p420_p9, %p417_p8 }
  0x1a   :  { %425 = shalt.err (!%p422_p10)
}
  0x1b   :  { %s426_s16 = scalar_lea.vmem %s576_s21, 1024  ;;  %p431_p12 = scmp.lt.s32.totalorder %s576_s21, %s576_s21 }
  0x1c   :  { %p427_p11 = scmp.ne.s32.totalorder %s576_s21, %s426_s16  ;;  %p432_p13 = scmp.lt.s32.totalorder %s426_s16, %s426_s16 }
  0x1e   :  { %p433_p0 = por %p432_p13, %p431_p12 }
  0x20   :  { %p434_p1 = pnand %p433_p0, %p427_p11 }
  0x22   :  { %437 = shalt.err (!%p434_p1)
}
  0x23   :  { %59 = dma.hbm_to_vmem [thread:$0]  %s674_s3, 1024, %s576_s21, [#allocation10], %s536_s30, %s536_s30, %s537_s6  }
  0x24   :  { %s538_s18 = smov [#allocation3]   ;;  %s539_s20 = smov [#allocation8]  }
  0x25   :  { %s19_s19 = sshll.u32 %s538_s18, 4  ;;  %s44_s22 = sshll.u32 %s539_s20, 4  ;;  %s20_s19 = int_to_ptr.vmem [resolvable:$true] %s19_s19  ;;  %s45_s22 = int_to_ptr.vmem [resolvable:$true] %s44_s22 }
  0x26   :  { %s438_s25 = scalar_lea.hbm %s671_s0, 128 }
  0x27   :  { %p439_p2 = scmp.ne.s32.totalorder %s671_s0, %s438_s25  ;;  %p442_p3 = scmp.lt.u32.totalorder %s438_s25, %s671_s0 }
  0x29   :  { %p444_p4 = pnand %p442_p3, %p439_p2 }
  0x2b   :  { %447 = shalt.err (!%p444_p4)
}
  0x2c   :  { %s448_s3 = scalar_lea.vmem %s20_s19, 128  ;;  %p453_p6 = scmp.lt.s32.totalorder %s20_s19, %s20_s19 }
  0x2d   :  { %p449_p5 = scmp.ne.s32.totalorder %s20_s19, %s448_s3  ;;  %p454_p7 = scmp.lt.s32.totalorder %s448_s3, %s448_s3 }
  0x2f   :  { %p455_p8 = por %p454_p7, %p453_p6 }
  0x31   :  { %p456_p9 = pnand %p455_p8, %p449_p5 }
  0x33   :  { %459 = shalt.err (!%p456_p9)
}
  0x34   :  { %25 = dma.hbm_to_vmem [thread:$0]  %s671_s0, 128, %s20_s19, [#allocation4], %s536_s30, %s536_s30, %s537_s6  }
  0x35   :  { %s460_s10 = scalar_lea.hbm %s673_s2, 16 }
  0x36   :  { %p461_p10 = scmp.ne.s32.totalorder %s673_s2, %s460_s10  ;;  %p464_p11 = scmp.lt.u32.totalorder %s460_s10, %s673_s2 }
  0x38   :  { %p466_p12 = pnand %p464_p11, %p461_p10 }
  0x3a   :  { %469 = shalt.err (!%p466_p12)
}
  0x3b   :  { %s470_s15 = scalar_lea.vmem %s45_s22, 16  ;;  %s474_s16 = scalar_lea.vmem %s45_s22, 32 }
  0x3c   :  { %p471_p13 = scmp.ne.s32.totalorder %s45_s22, %s470_s15  ;;  %p475_p0 = scmp.lt.s32.totalorder %s45_s22, %s45_s22 }
  0x3d   :  { %p476_p1 = scmp.lt.s32.totalorder %s474_s16, %s470_s15 }
  0x3f   :  { %p477_p2 = por %p476_p1, %p475_p0 }
  0x41   :  { %p478_p3 = pnand %p477_p2, %p471_p13 }
  0x43   :  { %481 = shalt.err (!%p478_p3)
}
  0x44   :  { %47 = dma.hbm_to_vmem [thread:$0]  %s673_s2, 16, %s45_s22, [#allocation7]  }
  0x45   :  { %s540_s6 = smov [#allocation11]   ;;  %s482_s19 = scalar_lea.hbm %s675_s4, 16 }
  0x46   :  { %s66_s1 = sshll.u32 %s540_s6, 4  ;;  %p483_p4 = scmp.ne.s32.totalorder %s675_s4, %s482_s19  ;;  %s67_s1 = int_to_ptr.vmem [resolvable:$true] %s66_s1 }
  0x47   :  { %p486_p5 = scmp.lt.u32.totalorder %s482_s19, %s675_s4 }
  0x49   :  { %p488_p6 = pnand %p486_p5, %p483_p4 }
  0x4b   :  { %491 = shalt.err (!%p488_p6)
}
  0x4c   :  { %s492_s26 = scalar_lea.vmem %s67_s1, 16  ;;  %s496_s2 = scalar_lea.vmem %s67_s1, 32 }
  0x4d   :  { %p493_p7 = scmp.ne.s32.totalorder %s67_s1, %s492_s26  ;;  %p497_p8 = scmp.lt.s32.totalorder %s67_s1, %s67_s1 }
  0x4e   :  { %p498_p9 = scmp.lt.s32.totalorder %s496_s2, %s492_s26 }
  0x50   :  { %p499_p10 = por %p498_p9, %p497_p8 }
  0x52   :  { %p500_p11 = pnand %p499_p10, %p493_p7 }
  0x54   :  { %503 = shalt.err (!%p500_p11)
}
  0x55   :  { %69 = dma.hbm_to_vmem [thread:$0]  %s675_s4, 16, %s67_s1, [#allocation10]  }
  0x56   :  { %526 = dma.done.wait [#allocation4], 128  }
  0x57   :  { %527 = vsyncadd [#allocation4], 4294967168 }
  0x58   :  { %528 = dma.done.wait [#allocation7], 272  }
  0x59   :  { %529 = vsyncadd [#allocation7], 4294967024 }
  0x5a   :  { %530 = dma.done.wait [#allocation10], 1040  }
  0x5b   :  { %531 = vsyncadd [#allocation10], 4294966256  ;;  %vm90_vm0 = vcmask 261120   ;;  %v541_v0 = vmov 0.0   ;;  %vm542_vm1 = vmmov 0   ;;  %v383_v1 = vld [vmem:[#allocation6] sm:$0xff]  }
  0x5c   :  { %343 = vmatprep.subr.bf16.mxu0 %v541_v0  ;;  %347 = vmatprep.mubr.msk.bf16.mxu0 %vm542_vm1, %v541_v0  ;;  %91 = vst.msk [vmem:[#allocation2] sm:$0xff] %vm90_vm0, %v541_v0  ;;  %92 = vst.msk [vmem:[#allocation2 + $0x8] sm:$0xff] %vm90_vm0, %v541_v0  ;;  %v384_v2 = vld [vmem:[#allocation6 + $0x8] sm:$0xff]   ;;  %v386_v3 = vld [vmem:[#allocation9] sm:$0xff]   ;;  %s543_s4 = smov [#allocation12]  }
  0x5d   :  { %351 = vmatprep.subr.bf16.mxu1 %v541_v0  ;;  %367 = vmatprep.mubr.msk.bf16.mxu1 %vm542_vm1, %v541_v0  ;;  %v385_v4 = vld [vmem:[#allocation3] sm:$0xff]   ;;  %v388_v6 = vld [vmem:[#allocation9 + $0x10] sm:$0xff]   ;;  %v389_v7 = vld [vmem:[#allocation9 + $0x18] sm:$0xff]   ;;  %s303_s28 = sshll.u32 %s543_s4, 4  ;;  %s304_s28 = int_to_ptr.vmem [resolvable:$true] %s303_s28 }
  0x5e   :  { %344 = vmatpush3.bf16.msra.mxu0 %v383_v1  ;;  %352 = vmatpush3.bf16.msra.mxu1 %v386_v3  ;;  %v387_v5 = vld [vmem:[#allocation9 + $0x8] sm:$0xff]   ;;  %v390_v8 = vld [vmem:[#allocation9 + $0x20] sm:$0xff]   ;;  %v392_v10 = vld [vmem:[#allocation9 + $0x30] sm:$0xff]   ;;  %s504_s29 = scalar_lea.vmem %s304_s28, 256  ;;  %p509_p13 = scmp.lt.s32.totalorder %s304_s28, %s304_s28 }
  0x5f   :  { %345 = vmatprep.subr.bf16.mxu0 %v541_v0  ;;  %353 = vmatprep.subr.bf16.mxu1 %v541_v0  ;;  %v391_v9 = vld [vmem:[#allocation9 + $0x28] sm:$0xff]   ;;  %v393_v11 = vld [vmem:[#allocation9 + $0x38] sm:$0xff]   ;;  %v330_v30 = vld [vmem:[#allocation11] ss:$0 sm:$0xff]  ;;  %p505_p12 = scmp.ne.s32.totalorder %s304_s28, %s504_s29  ;;  %p510_p0 = scmp.lt.s32.totalorder %s504_s29, %s504_s29 }
  0x60   :  { %v317_v12 = vld [vmem:[#allocation8] ss:$0 sm:$0xff] }
  0x61   :  { %p511_p1 = por %p510_p0, %p509_p13 }
  0x62   :  { %346 = vmatpush3.bf16.msra.mxu0 %v384_v2  ;;  %354 = vmatpush3.bf16.msra.mxu1 %v387_v5 }
  0x63   :  { %355 = vmatprep.subr.bf16.mxu1 %v541_v0  ;;  %v170_v22 = vld [vmem:[#allocation2] sm:$0xff]  ;;  %v171_v24 = vld [vmem:[#allocation2 + $0x8] sm:$0xff]  ;;  %p512_p2 = pnand %p511_p1, %p505_p12 }
  0x65   :  { %348 = vmatmul.mubr.msk.bf16.vlgmr.msra.gmra.mrb[0].mxu0 %vm90_vm0, %v385_v4 }
  0x66   :  { %356 = vmatpush3.bf16.msra.mxu1 %v388_v6 }
  0x67   :  { %357 = vmatprep.subr.bf16.mxu1 %v541_v0 }
  0x6a   :  { %358 = vmatpush3.bf16.msra.mxu1 %v389_v7 }
  0x6b   :  { %359 = vmatprep.subr.bf16.mxu1 %v541_v0 }
  0x6e   :  { %360 = vmatpush3.bf16.msra.mxu1 %v390_v8 }
  0x6f   :  { %361 = vmatprep.subr.bf16.mxu1 %v541_v0 }
  0x72   :  { %362 = vmatpush3.bf16.msra.mxu1 %v391_v9 }
  0x73   :  { %363 = vmatprep.subr.bf16.mxu1 %v541_v0 }
  0x76   :  { %364 = vmatpush3.bf16.msra.mxu1 %v392_v10 }
  0x77   :  { %365 = vmatprep.subr.bf16.mxu1 %v541_v0 }
  0x7a   :  { %366 = vmatpush3.bf16.msra.mxu1 %v393_v11 }
 0x138   :  { %v161_v13 = vpop.f32.mrb[0].mxu0 }
 0x139   :  { %v162_v14 = vadd.f32 %v317_v12, %v161_v13  ;;  %v349_v15 = vpop.f32.mrb[1].mxu0 }
 0x13a   :  { %v164_v16 = vpop.f32.mrb[2].mxu0 }
 0x13b   :  { %v165_v17 = vadd.f32 %v317_v12, %v164_v16  ;;  %v350_v18 = vpop.f32.mrb[3].mxu0  ;;  %v168_v19 = vmax.f32 %v162_v14, 0.0 }
 0x13d   :  { %v169_v20 = vmax.f32 %v165_v17, 0.0 }
 0x13f   :  { %v172_v21 = vpack.c.bf16 %v169_v20, %v168_v19 }
 0x141   :  { %368 = vmatmul.mubr.bf16.vlgmr.msra.gmra.mrb[0].mxu1 %v172_v21 }
 0x214   :  { %v271_v23 = vpop.f32.mrb[0].mxu1 }
 0x215   :  { %v278_v25 = vadd.f32 %v271_v23, %v170_v22  ;;  %v369_v26 = vpop.f32.mrb[1].mxu1 }
 0x216   :  { %v274_v27 = vpop.f32.mrb[2].mxu1 }
 0x217   :  { %280 = vst.msk [vmem:[#allocation2] sm:$0xff] %vm90_vm0, %v278_v25  ;;  %v279_v28 = vadd.f32 %v274_v27, %v171_v24  ;;  %v370_v29 = vpop.f32.mrb[3].mxu1 }
 0x219   :  { %281 = vst.msk [vmem:[#allocation2 + $0x8] sm:$0xff] %vm90_vm0, %v279_v28 }
 0x21e   :  { %v285_v31 = vld [vmem:[#allocation2] sm:$0xff] }
 0x21f   :  { %v294_v32 = vadd.f32 %v330_v30, %v285_v31 }
 0x220   :  { %v286_v33 = vld [vmem:[#allocation2 + $0x8] sm:$0xff] }
 0x221   :  { %v295_v34 = vadd.f32 %v330_v30, %v286_v33  ;;  %296 = vst.msk [vmem:[#allocation12] sm:$0xff] %vm90_vm0, %v294_v32 }
 0x223   :  { %297 = vst.msk [vmem:[#allocation12 + $0x8] sm:$0xff] %vm90_vm0, %v295_v34 }
 0x224   :  { %515 = shalt.err (!%p512_p2)
}
 0x225   :  { %s516_s7 = scalar_lea.hbm %s676_s5, 256 }
 0x226   :  { %p517_p3 = scmp.ne.s32.totalorder %s676_s5, %s516_s7  ;;  %p520_p4 = scmp.lt.u32.totalorder %s516_s7, %s676_s5 }
 0x228   :  { %p522_p5 = pnand %p520_p4, %p517_p3 }
 0x22a   :  { %525 = shalt.err (!%p522_p5)
}
 0x22b   :  { %s544_s12 = smov 128   ;;  %s545_s13 = smov 8  }
 0x22c   :  { %309 = dma.vmem_to_hbm [thread:$0]  %s304_s28, 256, %s676_s5, [#allocation5], %s544_s12, %s544_s12, %s545_s13  }
 0x22d   :  { %532 = dma.done.wait [#allocation5], 256  }
 0x22e   :  { %533 = vsyncadd [#allocation5], 4294967040 }
 0x22f   :  { %313 = vsyncpa [#allocation4], 1 }
 0x230   :  { %314 = vsyncpa [#allocation7], 1 }
 0x231   :  { %315 = vsyncpa [#allocation10], 1 }
 0x232   :  { %316 = vsyncpa [#allocation5], 1 }

</bundles_post_ra>
